<compile_context>
chip_gen: v7x
topology: tpu7x:2x2x1
jax: 0.10.0
libtpu: 0.0.40
codegen_flags: <defaults>
</compile_context>

<pallas_src>
import math
import jax
import jax.numpy as jnp
from jax.experimental import pallas as pl
from jax.experimental.pallas import tpu as pltpu


def _round_up(x, m):
    return ((x + m - 1) // m) * m


def _vmem_budget_bytes():
    """Generation-aware VMEM budget: ~75% of physical, capped at 100 MiB.

    v7x (64 MiB/TC) -> 48 MiB; v5e/v6e (128 MiB) -> 96 MiB.  Leaves headroom
    for compiler/internal scratch so we never request the full physical VMEM.
    """
    try:
        phys = int(pltpu.get_tpu_info().vmem_capacity_bytes)
    except Exception:
        phys = 64 << 20  # conservative (v7x-sized) fallback
    return min((phys * 3) // 4, 100 << 20)


def tpf_forward(a, b, w1, w2, bias, *, tm_target=1024):
    """out = g*a + (1-g)*b with g = sigmoid(a@w1 + b@w2 + bias).

    a, b: [..., H] float32;  w1, w2: [H, H];  bias: [H].
    """
    H = a.shape[-1]
    assert b.shape == a.shape
    assert w1.shape == (H, H) and w2.shape == (H, H) and bias.shape == (H,)

    lead = a.shape[:-1]
    M = 1
    for d in lead:
        M *= int(d)
    a2d = a.reshape(M, H)
    b2d = b.reshape(M, H)
    bias2d = bias.reshape(1, H)

    # ---- VMEM budget & row-tile selection ---------------------------------
    budget = _vmem_budget_bytes()
    weight_bytes = 2 * H * H * 4  # w1 + w2, f32, single copy

    # Grid-invariant blocks (constant index_map) are only DMA'd once; single
    # buffer them when their residency is what actually pressures VMEM.
    single_buffer_invariants = weight_bytes >= (4 << 20)
    w_buf_factor = 1 if single_buffer_invariants else 2

    def vmem_bytes(t):
        return (2 * t * H * 4 * 2          # a, b row tiles (f32), double-buffered
                + 2 * t * H * 4            # out tile (f32), double-buffered
                + 3 * t * H * 4            # in-kernel f32 temporaries (pre/gate/blend)
                + w_buf_factor * weight_bytes
                + w_buf_factor * 2 * H * 4)  # bias

    # Largest row tile (multiple of 8) that fits the budget; never wider than M.
    tm = _round_up(min(tm_target, _round_up(M, 8)), 8)
    while tm > 8 and vmem_bytes(tm) > budget:
        tm = _round_up(max(8, tm // 2), 8)
    # Keep >= 2 row-grid steps when M allows so the "parallel" axis can be
    # sharded across both v7x TensorCores (no effect on v5e/v6e, 1 TC).
    if M > 8 and pl.cdiv(M, tm) < 2:
        tm = _round_up(pl.cdiv(M, 2), 8)
    # TODO(synk): add an output-column (N) grid axis once the resident [H,H]
    # weights no longer fit VMEM even single-buffered (H >~ 3072 on v7x).

    grid = (pl.cdiv(M, tm),)

    invariant_kw = (
        dict(pipeline_mode=pl.Buffered(1)) if single_buffer_invariants else {})

    def kernel(a_ref, b_ref, w1_ref, w2_ref, bias_ref, o_ref):
        a_t = a_ref[...]                                   # [tm, H] f32
        b_t = b_ref[...]
        pre = (jnp.dot(a_t, w1_ref[...], preferred_element_type=jnp.float32)
               + jnp.dot(b_t, w2_ref[...], preferred_element_type=jnp.float32)
               + bias_ref[...])                            # MXU, f32 accumulate
        gate = jax.nn.sigmoid(pre)                         # EUP exp + VPU
        o_ref[...] = (b_t + gate * (a_t - b_t)).astype(o_ref.dtype)

    cost = pl.CostEstimate(
        flops=4 * M * H * H,                    # two [M,H]x[H,H] matmuls
        transcendentals=M * H,                  # sigmoid
        bytes_accessed=3 * M * H * 4 + weight_bytes + H * 4,
    )

    out2d = pl.pallas_call(
        kernel,
        out_shape=jax.ShapeDtypeStruct((M, H), a.dtype),
        grid_spec=pltpu.PrefetchScalarGridSpec(
            num_scalar_prefetch=0,
            grid=grid,
            in_specs=[
                pl.BlockSpec((tm, H), lambda i: (i, 0)),                 # a rows
                pl.BlockSpec((tm, H), lambda i: (i, 0)),                 # b rows
                pl.BlockSpec((H, H), lambda i: (0, 0), **invariant_kw),  # w1
                pl.BlockSpec((H, H), lambda i: (0, 0), **invariant_kw),  # w2
                pl.BlockSpec((1, H), lambda i: (0, 0), **invariant_kw),  # bias
            ],
            out_specs=pl.BlockSpec((tm, H), lambda i: (i, 0)),
        ),
        compiler_params=pltpu.CompilerParams(
            dimension_semantics=("parallel",),
            vmem_limit_bytes=int(budget),
        ),
        cost_estimate=cost,
    )(a2d, b2d, w1, w2, bias2d)

    return out2d.reshape(*lead, H)


def reference_forward(a, b, w1, w2, bias):
    wa = jnp.matmul(a, w1)
    wb = jnp.matmul(b, w2)
    gate = jax.nn.sigmoid(wa + wb + bias)
    return gate * a + (1.0 - gate) * b


if __name__ == "__main__":
    # Small shapes consistent with the module: batch=2, seq=8, hidden=128
    # (hidden=128 keeps the lane dimension TPU-native; other H also works).
    batch, seq, hidden = 2, 8, 128
    num_hidden_a = num_hidden_b = num_hidden = hidden

    key = jax.random.PRNGKey(0)
    k_a, k_b, k_w1, k_w2, k_bias = jax.random.split(key, 5)

    # Deterministic parameter init mirroring reset_parameter():
    stdv1 = 1.0 / math.sqrt(num_hidden)
    stdv2 = 1.0 / math.sqrt(num_hidden)
    stdv = (stdv1 + stdv2) / 2.0
    w1 = jax.random.uniform(k_w1, (num_hidden_a, num_hidden),
                            minval=-stdv1, maxval=stdv1, dtype=jnp.float32)
    w2 = jax.random.uniform(k_w2, (num_hidden_b, num_hidden),
                            minval=-stdv2, maxval=stdv2, dtype=jnp.float32)
    bias = jax.random.uniform(k_bias, (num_hidden,),
                              minval=-stdv, maxval=stdv, dtype=jnp.float32)

    a = jax.random.normal(k_a, (batch, seq, num_hidden_a), dtype=jnp.float32)
    b = jax.random.normal(k_b, (batch, seq, num_hidden_b), dtype=jnp.float32)

    out = tpf_forward(a, b, w1, w2, bias)
    jax.block_until_ready(out)

    ref = reference_forward(a, b, w1, w2, bias)
    assert out.shape == ref.shape
    assert jnp.allclose(out, ref, atol=2e-2, rtol=2e-2), "mismatch vs reference"

    print("KERNEL_OK")
</pallas_src>

<mosaic_0001>
module attributes {stable_mosaic.version = 11 : i64} {
  func.func @kernel(%arg0: i32, %arg1: memref<8x128xf32, #tpu.memory_space<vmem>>, %arg2: memref<8x128xf32, #tpu.memory_space<vmem>>, %arg3: memref<128x128xf32, #tpu.memory_space<vmem>>, %arg4: memref<128x128xf32, #tpu.memory_space<vmem>>, %arg5: memref<1x128xf32, #tpu.memory_space<vmem>>, %arg6: memref<8x128xf32, #tpu.memory_space<vmem>>) attributes {dimension_semantics = [#tpu.dimension_semantics<parallel>], iteration_bounds = array<i64: 2>, scalar_prefetch = 0 : i64, scratch_operands = 0 : i64, tpu.core_type = #tpu.core_type<tc>, window_params = [{transform_indices = @transform_0, window_bounds = array<i64: 8, 128>}, {transform_indices = @transform_1, window_bounds = array<i64: 8, 128>}, {pipeline_mode = #tpu.pipeline_mode<synchronous>, transform_indices = @transform_2, window_bounds = array<i64: 128, 128>}, {pipeline_mode = #tpu.pipeline_mode<synchronous>, transform_indices = @transform_3, window_bounds = array<i64: 128, 128>}, {pipeline_mode = #tpu.pipeline_mode<synchronous>, transform_indices = @transform_4, window_bounds = array<i64: 1, 128>}, {transform_indices = @transform_5, window_bounds = array<i64: 8, 128>}]} {
    %c0 = arith.constant 0 : index
    %c0_0 = arith.constant 0 : index
    %0 = vector.load %arg1[%c0, %c0_0] : memref<8x128xf32, #tpu.memory_space<vmem>>, vector<8x128xf32>
    %c0_1 = arith.constant 0 : index
    %c0_2 = arith.constant 0 : index
    %1 = vector.load %arg2[%c0_1, %c0_2] : memref<8x128xf32, #tpu.memory_space<vmem>>, vector<8x128xf32>
    %c0_3 = arith.constant 0 : index
    %c0_4 = arith.constant 0 : index
    %2 = vector.load %arg3[%c0_3, %c0_4] : memref<128x128xf32, #tpu.memory_space<vmem>>, vector<128x128xf32>
    %cst = arith.constant dense<0.000000e+00> : vector<8x128xf32>
    %3 = tpu.matmul %0, %2, %cst {dimension_numbers = #tpu.dot_dimension_numbers<[1], [0], [0], [1], [0, 0, 1, 1], [], []>} : vector<8x128xf32>, vector<128x128xf32>, vector<8x128xf32> -> vector<8x128xf32>
    %c0_5 = arith.constant 0 : index
    %c0_6 = arith.constant 0 : index
    %4 = vector.load %arg4[%c0_5, %c0_6] : memref<128x128xf32, #tpu.memory_space<vmem>>, vector<128x128xf32>
    %cst_7 = arith.constant dense<0.000000e+00> : vector<8x128xf32>
    %5 = tpu.matmul %1, %4, %cst_7 {dimension_numbers = #tpu.dot_dimension_numbers<[1], [0], [0], [1], [0, 0, 1, 1], [], []>} : vector<8x128xf32>, vector<128x128xf32>, vector<8x128xf32> -> vector<8x128xf32>
    %6 = arith.addf %3, %5 : vector<8x128xf32>
    %c0_8 = arith.constant 0 : index
    %c0_9 = arith.constant 0 : index
    %7 = vector.load %arg5[%c0_8, %c0_9] : memref<1x128xf32, #tpu.memory_space<vmem>>, vector<1x128xf32>
    %8 = vector.broadcast %7 : vector<1x128xf32> to vector<8x128xf32>
    %9 = arith.addf %6, %8 : vector<8x128xf32>
    %10 = arith.negf %9 : vector<8x128xf32>
    %11 = math.exp %10 : vector<8x128xf32>
    %cst_10 = arith.constant 1.000000e+00 : f32
    %12 = vector.broadcast %cst_10 : f32 to vector<8x128xf32>
    %13 = arith.addf %12, %11 : vector<8x128xf32>
    %14 = arith.divf %12, %13 : vector<8x128xf32>
    %15 = arith.subf %0, %1 : vector<8x128xf32>
    %16 = arith.mulf %14, %15 : vector<8x128xf32>
    %17 = arith.addf %1, %16 : vector<8x128xf32>
    %c0_11 = arith.constant 0 : index
    %c0_12 = arith.constant 0 : index
    %18 = vector.load %arg6[%c0_11, %c0_12] : memref<8x128xf32, #tpu.memory_space<vmem>>, vector<8x128xf32>
    tpu.vector_store %arg6[%c0_11, %c0_12], %17 {strides = array<i32>} : memref<8x128xf32, #tpu.memory_space<vmem>>, vector<8x128xf32>,
    return
  }
  func.func @transform_0(%arg0: i32) -> (i32, i32) {
    %c0_i32 = arith.constant 0 : i32
    %c0_i32_0 = arith.constant 0 : i32
    return %arg0, %c0_i32 : i32, i32
  }
  func.func @transform_1(%arg0: i32) -> (i32, i32) {
    %c0_i32 = arith.constant 0 : i32
    %c0_i32_0 = arith.constant 0 : i32
    return %arg0, %c0_i32 : i32, i32
  }
  func.func @transform_2(%arg0: i32) -> (i32, i32) {
    %c0_i32 = arith.constant 0 : i32
    %c0_i32_0 = arith.constant 0 : i32
    %c0_i32_1 = arith.constant 0 : i32
    return %c0_i32, %c0_i32_0 : i32, i32
  }
  func.func @transform_3(%arg0: i32) -> (i32, i32) {
    %c0_i32 = arith.constant 0 : i32
    %c0_i32_0 = arith.constant 0 : i32
    %c0_i32_1 = arith.constant 0 : i32
    return %c0_i32, %c0_i32_0 : i32, i32
  }
  func.func @transform_4(%arg0: i32) -> (i32, i32) {
    %c0_i32 = arith.constant 0 : i32
    %c0_i32_0 = arith.constant 0 : i32
    %c0_i32_1 = arith.constant 0 : i32
    return %c0_i32, %c0_i32_0 : i32, i32
  }
  func.func @transform_5(%arg0: i32) -> (i32, i32) {
    %c0_i32 = arith.constant 0 : i32
    %c0_i32_0 = arith.constant 0 : i32
    return %arg0, %c0_i32 : i32, i32
  }
}

</mosaic_0001>

<bundles_post_ra>
// kernel: tpu_custom_call.1
= control target key start
LH: loop header
LB: loop body
LE: loop exit
PB: predicated region body
PF: predicated region fallthrough
CT: control target
= control target key end

     0   :  { %s1411_s0 = inlined_call_operand.hbm [shape: f32[16,128], index: 0, kind: input, shape index: {}]   ;;  %s1412_s1 = inlined_call_operand.hbm [shape: f32[16,128], index: 1, kind: input, shape index: {}]   ;;  %s1413_s2 = inlined_call_operand.hbm [shape: f32[128,128], index: 2, kind: input, shape index: {}]   ;;  %s1414_s3 = inlined_call_operand.hbm [shape: f32[128,128], index: 3, kind: input, shape index: {}]   ;;  %s1415_s4 = inlined_call_operand.vmem [shape: f32[1,128], index: 4, kind: input, shape index: {}]   ;;  %s1416_s5 = inlined_call_operand.hbm [shape: f32[16,128], index: 5, kind: output, shape index: {}]  }
   0x1   :  { %1421 = sst [smem:[#allocation16_spill]] %s1413_s2 }
   0x2   :  { %1422 = sst [smem:[#allocation17_spill]] %s1414_s3 }
   0x3   :  { %10 = vsyncpa [#allocation3], 0 }
   0x4   :  { %12 = vsyncpa [#allocation3 + $0x1], 0 }
   0x5   :  { %13 = vsyncpa [#allocation6], 0 }
   0x6   :  { %15 = vsyncpa [#allocation6 + $0x1], 0 }
   0x7   :  { %16 = vsyncpa [#allocation9], 0 }
   0x8   :  { %17 = vsyncpa [#allocation4], 0 }
   0x9   :  { %19 = vsyncpa [#allocation4 + $0x1], 0  ;;  %s1114_s18 = smov 0   ;;  %s1116_s19 = smov 0  }
   0xa   :  { %s1118_s20 = smov 0   ;;  %s1120_s21 = smov 0  }
   0xb LB: > { %s1135_s22 = sadd.s32 4294967295, %s1072_s21   ;;  %s624_s23 = sadd.s32 4294967294, %s1072_s21   ;;  %s1072_s21 = sphi %s1120_s21, %s1444_s21   ;;  %s1068_s20 = sphi %s1118_s20, %s1443_s20   ;;  %s1064_s19 = sphi %s1116_s19, %s1442_s19   ;;  %s1060_s18 = sphi %s1114_s18, %s1441_s18  }
   0xc   : > { %p45_p0 = scmp.ne.s32.totalorder %s1064_s19, %s1060_s18  ;;  %p1417_p1 = scmp.eq.s32.totalorder %s1135_s22, 0 }
   0xd   : > { %p164_p3 = scmp.eq.s32.totalorder %s624_s23, 1  ;;  %p625_p5 = scmp.ge.s32.totalorder %s1072_s21, 1 }
   0xe   : > { %p1144_p4 = por %p1417_p1, %p45_p0  ;;  %p171_p7 = scmp.lt.s32.totalorder %s1072_s21, 3 }
   0xf   : > { %p1149_p6 = por %p164_p3, %p45_p0  ;;  %s1074_s27 = smov [#allocation7]  }
  0x10   : > { %s1423_s24 = scalar_select %p1144_p4, 1, 0 }
  0x11   : > { %s1424_s25 = scalar_select %p1149_p6, 1, 0 }
  0x12   : > { %p1154_p8 = pnand %p625_p5, %p171_p7  ;;  %s183_s28 = sshll.u32 %s1074_s27, 4  ;;  %s1158_s28 = int_to_ptr.vmem [resolvable:$true] %s183_s28 }
  0x13   : > { %s1075_s30 = smov [#allocation8]   ;;  %s1427_s2 = sld [smem:[#allocation16_spill]] }
  0x14   : > { %s1425_s26 = scalar_select %p1154_p8, 1, 0 }
  0x15   : > { %p811_p9 = pneg %p1154_p8  ;;  %s196_s6 = sshll.u32 %s1075_s30, 4  ;;  %s1169_s6 = int_to_ptr.vmem [resolvable:$true] %s196_s6 }
  0x17   : > { %p1165_p11 = pnand %p811_p9, %p1417_p1 }
  0x19   : > { %s878_s9 = scalar_lea.hbm %s1427_s2, 2048  ;;  %p880_p13 = pneg %p1165_p11 }
  0x1a   : > { %p879_p12 = scmp.ne.s32.totalorder %s1427_s2, %s878_s9  ;;  %p885_p5 = scmp.lt.u32.totalorder %s878_s9, %s1427_s2 }
  0x1c   : > { %p881_p0 = pnand %p880_p13, %p879_p12 }
  0x1e   : > { %p882_p3 = pneg %p881_p0 }
  0x20   : > { %p887_p7 = pnand %p885_p5, %p882_p3 }
  0x22   : > { %890 = shalt.err (!%p887_p7)
}
  0x23   : > { %s891_s14 = scalar_lea.vmem %s1158_s28, 2048  ;;  %p899_p2 = scmp.lt.s32.totalorder %s1158_s28, %s1158_s28 }
  0x24   : > { %p892_p9 = scmp.ne.s32.totalorder %s1158_s28, %s891_s14  ;;  %p900_p12 = scmp.lt.s32.totalorder %s891_s14, %s891_s14 }
  0x26   : > { %p894_p10 = pnand %p892_p9, %p880_p13  ;;  %p901_p0 = por %p900_p12, %p899_p2 }
  0x28   : > { %p895_p1 = pneg %p894_p10 }
  0x2a   : > { %p902_p6 = pnand %p901_p0, %p895_p1 }
  0x2c   : > { %905 = shalt.err (!%p902_p6)
}
  0x2d   : > { %s1076_s15 = smov 128   ;;  %s1077_s16 = smov 8  }
  0x2e   : > { %814 = dma.hbm_to_vmem [thread:$0]  (!%p1165_p11), %s1427_s2, 2048, %s1158_s28, [#allocation6], %s1076_s15, %s1076_s15, %s1077_s16  }
  0x2f   : > { %s1428_s3 = sld [smem:[#allocation17_spill]] }
  0x35   : > { %s906_s7 = scalar_lea.hbm %s1428_s3, 2048 }
  0x36   : > { %p907_p2 = scmp.ne.s32.totalorder %s1428_s3, %s906_s7  ;;  %p913_p10 = scmp.lt.u32.totalorder %s906_s7, %s1428_s3 }
  0x38   : > { %p909_p1 = pnand %p907_p2, %p880_p13 }
  0x3a   : > { %p910_p6 = pneg %p909_p1 }
  0x3c   : > { %p915_p3 = pnand %p913_p10, %p910_p6 }
  0x3e   : > { %918 = shalt.err (!%p915_p3)
}
  0x3f   : > { %s919_s28 = scalar_lea.vmem %s1169_s6, 2048  ;;  %p927_p12 = scmp.lt.s32.totalorder %s1169_s6, %s1169_s6 }
  0x40   : > { %p920_p5 = scmp.ne.s32.totalorder %s1169_s6, %s919_s28  ;;  %p928_p0 = scmp.lt.s32.totalorder %s919_s28, %s919_s28 }
  0x42   : > { %p922_p7 = pnand %p920_p5, %p880_p13  ;;  %p929_p2 = por %p928_p0, %p927_p12 }
  0x44   : > { %p923_p9 = pneg %p922_p7 }
  0x46   : > { %p930_p1 = pnand %p929_p2, %p923_p9 }
  0x48   : > { %933 = shalt.err (!%p930_p1)
}
  0x49   : > { %817 = dma.hbm_to_vmem [thread:$0]  (!%p1165_p11), %s1428_s3, 2048, %s1169_s6, [#allocation9], %s1076_s15, %s1076_s15, %s1077_s16  }
  0x4a   : > { %s1224_s14 = sadd.s32 1, %s1072_s21   ;;  %s32_s29 = sadd.s32 1, %s1068_s20 }
  0x4b   : > { %s29_s17 = ssub.s32 %s1072_s21, %s1224_s14  ;;  %p39_p13 = scmp.ne.s32.totalorder %s1068_s20, %s1064_s19 }
  0x4c   : > { %p30_p6 = scmp.eq.s32.totalorder %s29_s17, 0  ;;  %p40_p10 = scmp.eq.s32.totalorder %s1072_s21, 0 }
  0x4d   : > { %p1429_p3 = scmp.eq.s32.totalorder %s1135_s22, 1  ;;  %p831_p7 = scmp.lt.s32.totalorder %s1072_s21, 2 }
  0x4e   : > { %s1240_s27 = scalar_select %p30_p6, %s1068_s20, %s32_s29  }
  0x4f   : > { %p1234_p5 = por %p1429_p3, %p39_p13  ;;  %p41_p9 = por %p40_p10, %p39_p13 }
  0x50   : > { %s213_s30 = sand.u32 1, %s1068_s20   ;;  %s630_s15 = sshll.u32 %s1072_s21, 7 }
  0x51   : > { %s1430_s23 = scalar_select %p1234_p5, 1, 0 }
  0x52   : > { %s1243_s6 = sshll.u32 %s213_s30, 3  ;;  %s1249_s8 = scalar_lea.hbm %s1411_s0, %s630_s15 }
  0x53   : > { %s217_s9 = scalar_lea.vmem [#allocation2], %s1243_s6  ;;  %p1254_p11 = pnand %p831_p7, %p41_p9 }
  0x54   : > { %s224_s10 = sshll.u32 %s217_s9, 4  ;;  %s1261_s13 = scalar_lea.hbm %s1412_s1, %s630_s15  ;;  %s1252_s10 = int_to_ptr.vmem [resolvable:$true] %s224_s10 }
  0x55   : > { %s231_s29 = sand.u32 1, %s1072_s21   ;;  %s214_s17 = scalar_lea.sflag [#allocation3], %s213_s30 }
  0x56   : > { %s934_s16 = scalar_lea.hbm %s1249_s8, 128  ;;  %p936_p0 = pneg %p1254_p11 }
  0x57   : > { %p935_p12 = scmp.ne.s32.totalorder %s1249_s8, %s934_s16  ;;  %s939_s2 = scalar_lea.hbm %s1411_s0, 256 }
  0x58   : > { %p940_p13 = scmp.lt.u32.totalorder %s1249_s8, %s1411_s0  ;;  %p941_p6 = scmp.lt.u32.totalorder %s939_s2, %s934_s16 }
  0x59   : > { %p937_p2 = pnand %p936_p0, %p935_p12  ;;  %p943_p3 = scmp.lt.u32.totalorder %s934_s16, %s1249_s8 }
  0x5a   : > { %p942_p10 = por %p941_p6, %p940_p13 }
  0x5b   : > { %p938_p1 = pneg %p937_p2 }
  0x5c   : > { %p944_p7 = por %p943_p3, %p942_p10 }
  0x5e   : > { %p945_p9 = pnand %p944_p7, %p938_p1 }
  0x60   : > { %948 = shalt.err (!%p945_p9)
}
  0x61   : > { %s949_s30 = scalar_lea.vmem %s1252_s10, 128  ;;  %s1078_s15 = smov [#allocation2]  }
  0x62   : > { %p950_p12 = scmp.ne.s32.totalorder %s1252_s10, %s949_s30  ;;  %s954_s12 = sshll.u32 %s1078_s15, 4  ;;  %s955_s12 = int_to_ptr.vmem [resolvable:$false] %s954_s12 }
  0x63   : > { %s956_s3 = scalar_lea.vmem %s955_s12, 256  ;;  %p957_p4 = scmp.lt.s32.totalorder %s1252_s10, %s955_s12 }
  0x64   : > { %p952_p2 = pnand %p950_p12, %p936_p0  ;;  %p958_p13 = scmp.lt.s32.totalorder %s956_s3, %s949_s30 }
  0x66   : > { %p953_p5 = pneg %p952_p2  ;;  %p959_p6 = por %p958_p13, %p957_p4 }
  0x68   : > { %p960_p10 = pnand %p959_p6, %p953_p5 }
  0x6a   : > { %963 = shalt.err (!%p960_p10)
}
  0x6b   : > { %821 = dma.hbm_to_vmem [thread:$0]  (!%p1254_p11), %s1249_s8, 128, %s1252_s10, %s214_s17  }
  0x6c   : > { %s235_s2 = scalar_lea.vmem [#allocation5], %s1243_s6  ;;  %s232_s7 = scalar_lea.sflag [#allocation6], %s231_s29 }
  0x6d   : > { %s242_s16 = sshll.u32 %s235_s2, 4  ;;  %s964_s9 = scalar_lea.hbm %s1261_s13, 128  ;;  %s243_s16 = int_to_ptr.vmem [resolvable:$true] %s242_s16 }
  0x6e   : > { %p965_p4 = scmp.ne.s32.totalorder %s1261_s13, %s964_s9  ;;  %s969_s15 = scalar_lea.hbm %s1412_s1, 256 }
  0x6f   : > { %p970_p3 = scmp.lt.u32.totalorder %s1261_s13, %s1412_s1  ;;  %p971_p7 = scmp.lt.u32.totalorder %s969_s15, %s964_s9 }
  0x70   : > { %p967_p5 = pnand %p965_p4, %p936_p0  ;;  %p973_p12 = scmp.lt.u32.totalorder %s964_s9, %s1261_s13 }
  0x71   : > { %p972_p9 = por %p971_p7, %p970_p3 }
  0x72   : > { %p968_p1 = pneg %p967_p5 }
  0x73   : > { %p974_p2 = por %p973_p12, %p972_p9 }
  0x75   : > { %p975_p13 = pnand %p974_p2, %p968_p1 }
  0x77   : > { %978 = shalt.err (!%p975_p13)
}
  0x78   : > { %s979_s6 = scalar_lea.vmem %s243_s16, 128  ;;  %s1079_s8 = smov [#allocation5]  }
  0x79   : > { %p980_p6 = scmp.ne.s32.totalorder %s243_s16, %s979_s6  ;;  %s984_s10 = sshll.u32 %s1079_s8, 4  ;;  %s985_s10 = int_to_ptr.vmem [resolvable:$false] %s984_s10 }
  0x7a   : > { %s986_s29 = scalar_lea.vmem %s985_s10, 256  ;;  %p987_p5 = scmp.lt.s32.totalorder %s243_s16, %s985_s10 }
  0x7b   : > { %p982_p10 = pnand %p980_p6, %p936_p0  ;;  %p988_p8 = scmp.lt.s32.totalorder %s986_s29, %s979_s6 }
  0x7d   : > { %p983_p4 = pneg %p982_p10  ;;  %p989_p3 = por %p988_p8, %p987_p5 }
  0x7f   : > { %p990_p7 = pnand %p989_p3, %p983_p4 }
  0x81   : > { %993 = shalt.err (!%p990_p7)
}
  0x82   : > { %824 = dma.hbm_to_vmem [thread:$0]  (!%p1254_p11), %s1261_s13, 128, %s243_s16, %s232_s7  }
  0x83   : > { %p1432_p1 = scmp.ne.s32.totalorder %s1425_s26, 0 }
  0x84   : > { %s1314_s17 = sand.u32 (!%p1432_p1), 1, %s1064_s19   ;;  %p1433_p8 = scmp.ne.s32.totalorder (!%p1432_p1), %s1423_s24, 0 }
  0x85   : > { %251 = sbr.rel (%p1432_p1) target bundleno = 447 (0x1bf), region = 40  ;;  %s1317_s2 = sshll.u32 (!%p1432_p1), %s1314_s17, 3 }
  0x86   : > { %s254_s9 = scalar_lea.sflag (!%p1432_p1), [#allocation3], %s1314_s17  ;;  %s257_s28 = scalar_lea.vmem (!%p1432_p1), [#allocation2], %s1317_s2 }
  0x8c   : > { %1039 = dma.done.wait (%p1433_p8), %s254_s9, 128  }
  0x8d   : > { %1041 = vsyncadd (%p1433_p8), %s254_s9, 4294967168  ;;  %s262_s26 = sand.u32 1, %s1135_s22   ;;  %s266_s13 = scalar_lea.vmem [#allocation5], %s1317_s2 }
  0x8e   : > { %s263_s11 = scalar_lea.sflag [#allocation6], %s262_s26 }
  0x8f   : > { %1043 = dma.done.wait (%p1433_p8), %s263_s11, 128  }
  0x90   : > { %1045 = vsyncadd (%p1433_p8), %s263_s11, 4294967168  ;;  %p1434_p11 = scmp.eq.s32.totalorder %s1135_s22, 0 }
  0x92   : > { %1047 = dma.done.wait (%p1434_p11), [#allocation6], 2048   ;;  %p1435_p0 = pmov %p1434_p11 }
  0x94   : > { %1049 = vsyncadd (%p1435_p0), [#allocation6], 4294965248  ;;  %p1436_p9 = pmov %p1435_p0 }
  0x95   : > { %p1437_p12 = pmov %p1435_p0 }
  0x96   : > { %1051 = dma.done.wait (%p1436_p9), [#allocation9], 2048  }
  0x97   : > { %1053 = vsyncadd (%p1437_p12), [#allocation9], 4294965248  ;;  %v1080_v0 = vmov 0.0|0.0   ;;  %vm1081_vm0 = vmmov 0   ;;  %v1082_v1 = vmov 0.0   ;;  %v324_v2 = vld [vmem:[#allocation8] sm:$0xff] }
  0x98   : > { %749 = vmatprep.subr.bf16.mxu0 %v1080_v0  ;;  %773 = vmatprep.subr.bf16.mxu1 %v1080_v0  ;;  %v325_v3 = vld [vmem:[#allocation8 + $0x8] sm:$0xff]  ;;  %v308_v4 = vld [vmem:[#allocation7] sm:$0xff]  ;;  %v326_v7 = vld [vmem:[#allocation8 + $0x10] sm:$0xff]  ;;  %s642_s7 = sshll.u32 %s1135_s22, 7  ;;  %s305_s30 = scalar_lea.vmem [#allocation10], %s1317_s2 }
  0x99   : > { %711 = vmatprep.mubr.msk.f32.mxu0 %vm1081_vm0, %v1082_v1  ;;  %746 = vmatprep.mubr.msk.f32.mxu1 %vm1081_vm0, %v1082_v1  ;;  %v750_v5 = vpack.c.bf16 %v325_v3, %v324_v2  ;;  %v309_v6 = vld [vmem:[#allocation7 + $0x8] sm:$0xff]  ;;  %v327_v8 = vld [vmem:[#allocation8 + $0x18] sm:$0xff]  ;;  %v310_v10 = vld [vmem:[#allocation7 + $0x10] sm:$0xff]  ;;  %s512_s15 = sshll.u32 %s305_s30, 4  ;;  %s1367_s6 = scalar_lea.hbm %s1416_s5, %s642_s7  ;;  %s1369_s15 = int_to_ptr.vmem [resolvable:$true] %s512_s15 }
  0x9a   : > { %v774_v9 = vpack.c.bf16 %v309_v6, %v308_v4  ;;  %v311_v11 = vld [vmem:[#allocation7 + $0x18] sm:$0xff]  ;;  %v753_v12 = vpack.c.bf16 %v327_v8, %v326_v7  ;;  %v328_v14 = vld [vmem:[#allocation8 + $0x20] sm:$0xff]  ;;  %v329_v15 = vld [vmem:[#allocation8 + $0x28] sm:$0xff]  ;;  %s499_s8 = scalar_lea.sflag [#allocation4], %s1314_s17  ;;  %s994_s10 = scalar_lea.vmem %s1369_s15, 128 }
  0x9b   : > { %751 = vmatpush3.bf16.msra.mxu0 %v750_v5  ;;  %v777_v13 = vpack.c.bf16 %v311_v11, %v310_v10  ;;  %v312_v16 = vld [vmem:[#allocation7 + $0x20] sm:$0xff]  ;;  %v313_v17 = vld [vmem:[#allocation7 + $0x28] sm:$0xff]  ;;  %v756_v18 = vpack.c.bf16 %v329_v15, %v328_v14  ;;  %v330_v20 = vld [vmem:[#allocation8 + $0x30] sm:$0xff]  ;;  %p995_p2 = scmp.ne.s32.totalorder %s1369_s15, %s994_s10  ;;  %p1438_p13 = scmp.ne.s32.totalorder %s1430_s23, 0 }
  0x9c   : > { %775 = vmatpush3.bf16.msra.mxu1 %v774_v9  ;;  %752 = vmatprep.subr.bf16.mxu0 %v1080_v0  ;;  %v780_v19 = vpack.c.bf16 %v313_v17, %v312_v16  ;;  %v331_v21 = vld [vmem:[#allocation8 + $0x38] sm:$0xff]  ;;  %v314_v22 = vld [vmem:[#allocation7 + $0x30] sm:$0xff]  ;;  %v332_v26 = vld [vmem:[#allocation8 + $0x40] sm:$0xff]  ;;  %s1083_s22 = smov [#allocation10]  }
  0x9d   : > { %776 = vmatprep.subr.bf16.mxu1 %v1080_v0  ;;  %v315_v23 = vld [vmem:[#allocation7 + $0x38] sm:$0xff]  ;;  %v759_v24 = vpack.c.bf16 %v331_v21, %v330_v20  ;;  %v333_v27 = vld [vmem:[#allocation8 + $0x48] sm:$0xff]  ;;  %v316_v28 = vld [vmem:[#allocation7 + $0x40] sm:$0xff]  ;;  %p996_p6 = pnand %p995_p2, %p1438_p13  ;;  %s998_s29 = sshll.u32 %s1083_s22, 4  ;;  %s999_s29 = int_to_ptr.vmem [resolvable:$false] %s998_s29 }
  0x9e   : > { %v783_v25 = vpack.c.bf16 %v315_v23, %v314_v22  ;;  %v317_v29 = vld [vmem:[#allocation7 + $0x48] sm:$0xff]  ;;  %v762_v30 = vpack.c.bf16 %v333_v27, %v332_v26  ;;  %v334_v32 = vld [vmem:[#allocation8 + $0x50] sm:$0xff]  ;;  %v335_v33 = vld [vmem:[#allocation8 + $0x58] sm:$0xff]  ;;  %s1000_s2 = scalar_lea.vmem %s999_s29, 256  ;;  %p1001_p4 = scmp.lt.s32.totalorder %s1369_s15, %s999_s29 }
  0x9f   : > { %754 = vmatpush3.bf16.msra.mxu0 %v753_v12  ;;  %v786_v31 = vpack.c.bf16 %v317_v29, %v316_v28  ;;  %v318_v34 = vld [vmem:[#allocation7 + $0x50] sm:$0xff]  ;;  %v319_v35 = vld [vmem:[#allocation7 + $0x58] sm:$0xff]  ;;  %v765_v36 = vpack.c.bf16 %v335_v33, %v334_v32  ;;  %v336_v38 = vld [vmem:[#allocation8 + $0x60] sm:$0xff]  ;;  %p997_p10 = pneg %p996_p6  ;;  %p1002_p5 = scmp.lt.s32.totalorder %s1000_s2, %s994_s10 }
  0xa0   : > { %778 = vmatpush3.bf16.msra.mxu1 %v777_v13  ;;  %755 = vmatprep.subr.bf16.mxu0 %v1080_v0  ;;  %v789_v37 = vpack.c.bf16 %v319_v35, %v318_v34  ;;  %v337_v39 = vld [vmem:[#allocation8 + $0x68] sm:$0xff]  ;;  %v320_v40 = vld [vmem:[#allocation7 + $0x60] sm:$0xff]  ;;  %v338_v44 = vld [vmem:[#allocation8 + $0x70] sm:$0xff] }
  0xa1   : > { %779 = vmatprep.subr.bf16.mxu1 %v1080_v0  ;;  %v321_v41 = vld [vmem:[#allocation7 + $0x68] sm:$0xff]  ;;  %v768_v42 = vpack.c.bf16 %v337_v39, %v336_v38  ;;  %v339_v45 = vld [vmem:[#allocation8 + $0x78] sm:$0xff]  ;;  %v322_v46 = vld [vmem:[#allocation7 + $0x70] sm:$0xff]  ;;  %p1003_p3 = por %p1002_p5, %p1001_p4 }
  0xa2   : > { %v792_v43 = vpack.c.bf16 %v321_v41, %v320_v40  ;;  %v323_v47 = vld [vmem:[#allocation7 + $0x78] sm:$0xff]  ;;  %v771_v48 = vpack.c.bf16 %v339_v45, %v338_v44  ;;  %v306_v51 = vld [vmem:[%s257_s28] sm:$0xff] }
  0xa3   : > { %757 = vmatpush3.bf16.msra.mxu0 %v756_v18  ;;  %v795_v49 = vpack.c.bf16 %v323_v47, %v322_v46  ;;  %v307_v50 = vld [vmem:[%s266_s13] sm:$0xff]  ;;  %v639_v54 = vld [vmem:[%s1415_s4] ss:$0 sm:$0xff]  ;;  %p1004_p7 = pnand %p1003_p3, %p997_p10 }
  0xa4   : > { %781 = vmatpush3.bf16.msra.mxu1 %v780_v19  ;;  %758 = vmatprep.subr.bf16.mxu0 %v1080_v0  ;;  %v494_v62 = vsub.f32 %v306_v51, %v307_v50 }
  0xa5   : > { %782 = vmatprep.subr.bf16.mxu1 %v1080_v0 }
  0xa7   : > { %760 = vmatpush3.bf16.msra.mxu0 %v759_v24 }
  0xa8   : > { %784 = vmatpush3.bf16.msra.mxu1 %v783_v25  ;;  %761 = vmatprep.subr.bf16.mxu0 %v1080_v0 }
  0xa9   : > { %785 = vmatprep.subr.bf16.mxu1 %v1080_v0 }
  0xab   : > { %763 = vmatpush3.bf16.msra.mxu0 %v762_v30 }
  0xac   : > { %787 = vmatpush3.bf16.msra.mxu1 %v786_v31  ;;  %764 = vmatprep.subr.bf16.mxu0 %v1080_v0 }
  0xad   : > { %788 = vmatprep.subr.bf16.mxu1 %v1080_v0 }
  0xaf   : > { %766 = vmatpush3.bf16.msra.mxu0 %v765_v36 }
  0xb0   : > { %790 = vmatpush3.bf16.msra.mxu1 %v789_v37  ;;  %767 = vmatprep.subr.bf16.mxu0 %v1080_v0 }
  0xb1   : > { %791 = vmatprep.subr.bf16.mxu1 %v1080_v0 }
  0xb3   : > { %769 = vmatpush3.bf16.msra.mxu0 %v768_v42 }
  0xb4   : > { %793 = vmatpush3.bf16.msra.mxu1 %v792_v43  ;;  %770 = vmatprep.subr.bf16.mxu0 %v1080_v0 }
  0xb5   : > { %794 = vmatprep.subr.bf16.mxu1 %v1080_v0 }
  0xb7   : > { %772 = vmatpush3.bf16.msra.mxu0 %v771_v48 }
  0xb8   : > { %796 = vmatpush3.bf16.msra.mxu1 %v795_v49 }
  0xba   : > { %712 = vmatmul.mubr.f32.vlgmr.msra.gmra.mrb[0].mxu0 %v307_v50 }
  0xbb   : > { %747 = vmatmul.mubr.f32.vlgmr.msra.gmra.mrb[0].mxu1 %v306_v51 }
 0x18d   : > { %v406_v52 = vpop.f32.mrb[0].mxu0 }
 0x18e   : > { %v476_v53 = vpop.f32.mrb[0].mxu1  ;;  %v713_v55 = vpop.f32.mrb[1].mxu0 }
 0x18f   : > { %v477_v56 = vadd.f32 %v476_v53, %v406_v52  ;;  %v748_v57 = vpop.f32.mrb[1].mxu1 }
 0x191   : > { %v487_v58 = vadd.f32 %v639_v54, %v477_v56 }
 0x193   : > { %v640_v59 = vmul.f32 -1.442695, %v487_v58 }
 0x195   : > { %874 = vpow2.f32 %v640_v59 }
 0x19f   : > { %v875_v60 = vpop.eup %874 }
 0x1a0   : > { %v491_v61 = vadd.f32 1.0, %v875_v60 }
 0x1a2   : > { %876 = vrcp.f32 %v491_v61 }
 0x1ac   : > { %v877_v63 = vpop.eup %876 }
 0x1ad   : > { %v495_v0 = vmul.f32 %v877_v63, %v494_v62 }
 0x1af   : > { %v496_v1 = vadd.f32 %v495_v0, %v307_v50 }
 0x1b1   : > { %497 = vst [vmem:[%s305_s30] sm:$0xff] %v496_v1 }
 0x1b2   : > { %1007 = shalt.err (!%p1004_p7)
}
 0x1b3   : > { %s1008_s17 = scalar_lea.hbm %s1367_s6, 128  ;;  %s1012_s26 = scalar_lea.hbm %s1416_s5, 256 }
 0x1b4   : > { %p1009_p1 = scmp.ne.s32.totalorder %s1367_s6, %s1008_s17  ;;  %p1013_p0 = scmp.lt.u32.totalorder %s1367_s6, %s1416_s5 }
 0x1b5   : > { %p1014_p9 = scmp.lt.u32.totalorder %s1012_s26, %s1008_s17  ;;  %p1016_p2 = scmp.lt.u32.totalorder %s1008_s17, %s1367_s6 }
 0x1b6   : > { %p1010_p8 = pnand %p1009_p1, %p1438_p13 }
 0x1b7   : > { %p1015_p12 = por %p1014_p9, %p1013_p0 }
 0x1b8   : > { %p1011_p11 = pneg %p1010_p8 }
 0x1b9   : > { %p1017_p6 = por %p1016_p2, %p1015_p12 }
 0x1bb   : > { %p1018_p10 = pnand %p1017_p6, %p1011_p11 }
 0x1bd   : > { %1021 = shalt.err (!%p1018_p10)
}
 0x1be   : > { %809 = dma.vmem_to_hbm [thread:$0]  (%p1438_p13), %s1369_s15, 128, %s1367_s6, %s499_s8  }
 0x1bf PF: > { %s524_s24 = sand.u32 1, %s1060_s18   ;;  %p1439_p4 = scmp.ne.s32.totalorder %s1424_s25, 0 }
 0x1c0   : > { %p1440_p5 = scmp.ge.s32.totalorder %s1072_s21, 2  ;;  %s525_s16 = scalar_lea.sflag [#allocation4], %s524_s24 }
 0x1c2   : > { %p826_p3 = pnand %p1440_p5, %p1439_p4 }
 0x1c4   : > { %1055 = dma.done.wait (!%p826_p3), %s525_s16, 128  }
 0x1c5   : > { %1057 = vsyncadd (!%p826_p3), %s525_s16, 4294967168  ;;  %p22_p7 = scmp.ge.s32.totalorder %s1224_s14, 4   ;;  %s1441_s18 = smov %s1064_s19 }
 0x1c6   : > { %s1442_s19 = smov %s1068_s20  ;;  %s1443_s20 = smov %s1240_s27 }
 0x1c7   : > { %s1444_s21 = smov %s1224_s14  ;;  %24 = sbr.rel (!%p22_p7) target bundleno = 11 (0xb), region = 106 }
 0x1ce   :  { %530 = vsyncpa [#allocation3], 1 }
 0x1cf   :  { %532 = vsyncpa [#allocation3 + $0x1], 1 }
 0x1d0   :  { %533 = vsyncpa [#allocation6], 1 }
 0x1d1   :  { %535 = vsyncpa [#allocation6 + $0x1], 1 }
 0x1d2   :  { %536 = vsyncpa [#allocation9], 1 }
 0x1d3   :  { %537 = vsyncpa [#allocation4], 1 }
 0x1d4   :  { %539 = vsyncpa [#allocation4 + $0x1], 1 }

</bundles_post_ra>
